<compile_context>
chip_gen: v6e
topology: v6e:2x2x1
jax: 0.10.0
libtpu: 0.0.40
codegen_flags: <defaults>
</compile_context>

<pallas_src>
import functools

import jax
import jax.numpy as jnp
from jax.experimental import pallas as pl
from jax.experimental.pallas import tpu as pltpu


def _ls_loss_kernel(tgt_ref, pred_ref, loss_ref, *,
                    confidence, smooth_val, n_classes, chunk, n_chunks):
    coef_tgt = jnp.float32(confidence - smooth_val)
    sm = jnp.float32(smooth_val)
    ncls = jnp.float32(n_classes)

    def compute(logits_raw, tgt):
        logits = logits_raw.astype(jnp.float32)                     # (C, chunk)
        m = jnp.max(logits, axis=0, keepdims=True)                  # (1, chunk)
        # stable LSE over the class (sublane) axis; (logits - m) is consumed
        # only by exp so the compiler can fuse sub+exp per vreg.
        lse = jnp.log(jnp.sum(jnp.exp(logits - m), axis=0, keepdims=True))
        mlse = m + lse                                               # (1, chunk)
        cls = jax.lax.broadcasted_iota(jnp.int32, logits.shape, 0)
        logits_tgt = jnp.sum(jnp.where(cls == tgt, logits, 0.0),
                             axis=0, keepdims=True)                  # (1, chunk)
        logits_sum = jnp.sum(logits, axis=0, keepdims=True)          # (1, chunk)
        # loss = -(conf - sm) * logp[tgt] - sm * sum_c logp[c]
        return (-coef_tgt * (logits_tgt - mlse)
                - sm * (logits_sum - ncls * mlse))

    if n_chunks == 1:
        loss_ref[0] = compute(pred_ref[0], tgt_ref[0])
    else:
        def body(j, carry):
            start = pl.multiple_of(j * chunk, 128)
            loss_ref[0, :, pl.ds(start, chunk)] = compute(
                pred_ref[0, :, pl.ds(start, chunk)],
                tgt_ref[0, :, pl.ds(start, chunk)])
            return carry
        # unroll short trip counts fully for LLO visibility; partially otherwise
        jax.lax.fori_loop(0, n_chunks, body, 0,
                          unroll=True if n_chunks <= 8 else 8)


def _choose_tiles(B, C, P, itemsize):
    """Pick (tp, chunk): lane tile from a VMEM byte budget, inner lane chunk
    to bound vreg pressure."""
    LANE = 128
    if P % LANE != 0:
        # full-extent lane block keeps the (8,128) layout constraint satisfied
        return P, P

    PRED_BLOCK_BUDGET = 2 * 1024 * 1024          # ~2 MiB pred block per step
    tp = (PRED_BLOCK_BUDGET // (C * itemsize)) // LANE * LANE
    tp = max(LANE, min(tp, P))

    # keep >=2 parallel grid steps when possible so both v7x TCs get work
    while B * (-(-P // tp)) < 2 and tp > LANE:
        tp = max(LANE, (tp // 2) // LANE * LANE)

    # inner lane chunk: keep a (C, chunk) f32 temporary at ~<= 8 vregs
    chunk = max(LANE, min(512, (8192 // max(C, 1)) // LANE * LANE, tp))
    # tp must be a multiple of chunk for a uniform inner loop
    tp = max(chunk, (tp // chunk) * chunk)
    return tp, chunk


def label_smoothing_loss(pred, target, *, classes, smoothing=0.0):
    """pred: (B, C, P) float (any dtype), target: (B, P) int — torch layout."""
    B, C, P = pred.shape
    assert C == classes
    confidence = 1.0 - smoothing
    smooth_val = smoothing / (classes - 1) if classes > 1 else 0.0

    itemsize = jnp.dtype(pred.dtype).itemsize
    tp, chunk = _choose_tiles(B, C, P, itemsize)
    n_chunks = tp // chunk
    grid = (B, pl.cdiv(P, tp))

    tgt = target.reshape(B, 1, P).astype(jnp.int32)       # lane-dense targets

    # VMEM budgeting: double-buffered pred + tgt + out blocks.
    ws_bytes = 2 * (C * tp * itemsize + 2 * tp * 4)
    params = dict(dimension_semantics=("parallel", "parallel"))
    if ws_bytes > 12 * 1024 * 1024:
        # very large class counts force a big minimum block; raise the scoped
        # VMEM limit but stay safe on v7x's 64 MiB physical VMEM.
        if ws_bytes + (4 << 20) > 48 * 1024 * 1024:
            # TODO(synk): add a C-tiled streaming-logsumexp path (third
            # "arbitrary" grid axis carrying m/l scratch) for huge class counts.
            raise NotImplementedError(
                "class count too large for a single-block class reduction")
        params["vmem_limit_bytes"] = ws_bytes + (4 << 20)

    kernel = functools.partial(
        _ls_loss_kernel,
        confidence=confidence,
        smooth_val=smooth_val,
        n_classes=C,
        chunk=chunk,
        n_chunks=n_chunks,
    )

    per_point = pl.pallas_call(
        kernel,
        out_shape=jax.ShapeDtypeStruct((B, 1, P), jnp.float32),
        grid_spec=pltpu.PrefetchScalarGridSpec(
            num_scalar_prefetch=0,
            grid=grid,
            in_specs=[
                pl.BlockSpec((1, 1, tp), lambda b, p: (b, 0, p)),   # target
                pl.BlockSpec((1, C, tp), lambda b, p: (b, 0, p)),   # pred
            ],
            out_specs=pl.BlockSpec((1, 1, tp), lambda b, p: (b, 0, p)),
        ),
        compiler_params=pltpu.CompilerParams(**params),
    )(tgt, pred)

    # Final reduction: mean over the B*P per-point losses (tiny, leave to XLA).
    return jnp.mean(per_point)


def _reference(pred, target, *, classes, smoothing):
    # pure-JAX reference mirroring the torch module exactly
    confidence = 1.0 - smoothing
    smooth_val = smoothing / (classes - 1) if classes > 1 else 0.0
    logp = jax.nn.log_softmax(pred.astype(jnp.float32), axis=1)      # (B,C,P)
    onehot = jax.nn.one_hot(target, classes, axis=1, dtype=jnp.float32)
    true_dist = onehot * confidence + (1.0 - onehot) * smooth_val
    return jnp.mean(jnp.sum(-true_dist * logp, axis=1))


if __name__ == "__main__":
    key = jax.random.PRNGKey(0)
    k1, k2 = jax.random.split(key)

    B, C, P = 2, 16, 256        # batch, classes (dim=1), points
    smoothing = 0.1

    pred = jax.random.normal(k1, (B, C, P), dtype=jnp.float32)
    target = jax.random.randint(k2, (B, P), 0, C, dtype=jnp.int32)

    loss = label_smoothing_loss(pred, target, classes=C, smoothing=smoothing)
    loss = jax.block_until_ready(loss)

    ref = _reference(pred, target, classes=C, smoothing=smoothing)
    assert jnp.allclose(loss, ref, rtol=1e-5, atol=1e-5), (loss, ref)

    print("KERNEL_OK")
</pallas_src>

<mosaic_0001>
module attributes {stable_mosaic.version = 11 : i64} {
  func.func @_ls_loss_kernel(%arg0: i32, %arg1: i32, %arg2: memref<1x1x256xi32, #tpu.memory_space<vmem>>, %arg3: memref<1x16x256xf32, #tpu.memory_space<vmem>>, %arg4: memref<1x1x256xf32, #tpu.memory_space<vmem>>) attributes {dimension_semantics = [#tpu.dimension_semantics<parallel>, #tpu.dimension_semantics<parallel>], iteration_bounds = array<i64: 2, 1>, scalar_prefetch = 0 : i64, scratch_operands = 0 : i64, tpu.core_type = #tpu.core_type<tc>, window_params = [{transform_indices = @transform_0, window_bounds = array<i64: 1, 1, 256>}, {transform_indices = @transform_1, window_bounds = array<i64: 1, 16, 256>}, {transform_indices = @transform_2, window_bounds = array<i64: 1, 1, 256>}]} {
    %c0 = arith.constant 0 : index
    %c0_0 = arith.constant 0 : index
    %c0_1 = arith.constant 0 : index
    %0 = vector.load %arg3[%c0, %c0_0, %c0_1] : memref<1x16x256xf32, #tpu.memory_space<vmem>>, vector<1x16x256xf32>
    %1 = vector.shape_cast %0 : vector<1x16x256xf32> to vector<16x256xf32>
    %c0_2 = arith.constant 0 : index
    %c0_3 = arith.constant 0 : index
    %c0_4 = arith.constant 0 : index
    %2 = vector.load %arg2[%c0_2, %c0_3, %c0_4] : memref<1x1x256xi32, #tpu.memory_space<vmem>>, vector<1x1x256xi32>
    %3 = vector.shape_cast %2 : vector<1x1x256xi32> to vector<1x256xi32>
    %cst = arith.constant dense<0xFF800000> : vector<256xf32>
    %4 = vector.multi_reduction <maximumf>, %1, %cst [0] : vector<16x256xf32> to vector<256xf32>
    %5 = vector.shape_cast %4 : vector<256xf32> to vector<1x256xf32>
    %6 = vector.broadcast %5 : vector<1x256xf32> to vector<16x256xf32>
    %7 = arith.subf %1, %6 : vector<16x256xf32>
    %8 = math.exp %7 : vector<16x256xf32>
    %cst_5 = arith.constant dense<0.000000e+00> : vector<256xf32>
    %9 = vector.multi_reduction <add>, %8, %cst_5 [0] : vector<16x256xf32> to vector<256xf32>
    %10 = vector.shape_cast %9 : vector<256xf32> to vector<1x256xf32>
    %11 = math.log %10 : vector<1x256xf32>
    %12 = arith.addf %5, %11 : vector<1x256xf32>
    %13 = tpu.iota {dimensions = array<i32: 0>} : vector<16x256xi32>
    %14 = vector.broadcast %3 : vector<1x256xi32> to vector<16x256xi32>
    %15 = arith.cmpi eq, %13, %14 : vector<16x256xi32>
    %cst_6 = arith.constant 0.000000e+00 : f32
    %16 = vector.broadcast %cst_6 : f32 to vector<16x256xf32>
    %17 = arith.select %15, %1, %16 : vector<16x256xi1>, vector<16x256xf32>
    %cst_7 = arith.constant dense<0.000000e+00> : vector<256xf32>
    %18 = vector.multi_reduction <add>, %17, %cst_7 [0] : vector<16x256xf32> to vector<256xf32>
    %19 = vector.shape_cast %18 : vector<256xf32> to vector<1x256xf32>
    %cst_8 = arith.constant dense<0.000000e+00> : vector<256xf32>
    %20 = vector.multi_reduction <add>, %1, %cst_8 [0] : vector<16x256xf32> to vector<256xf32>
    %21 = vector.shape_cast %20 : vector<256xf32> to vector<1x256xf32>
    %cst_9 = arith.constant 0.000000e+00 : f32
    %cst_10 = arith.constant 0.893333315 : f32
    %22 = arith.subf %cst_9, %cst_10 : f32
    %23 = arith.subf %19, %12 : vector<1x256xf32>
    %24 = vector.broadcast %22 : f32 to vector<1x256xf32>
    %25 = arith.mulf %24, %23 : vector<1x256xf32>
    %cst_11 = arith.constant 1.600000e+01 : f32
    %26 = vector.broadcast %cst_11 : f32 to vector<1x256xf32>
    %27 = arith.mulf %26, %12 : vector<1x256xf32>
    %28 = arith.subf %21, %27 : vector<1x256xf32>
    %cst_12 = arith.constant 0.00666666683 : f32
    %29 = vector.broadcast %cst_12 : f32 to vector<1x256xf32>
    %30 = arith.mulf %29, %28 : vector<1x256xf32>
    %31 = arith.subf %25, %30 : vector<1x256xf32>
    %c0_13 = arith.constant 0 : index
    %c0_14 = arith.constant 0 : index
    %c0_15 = arith.constant 0 : index
    %32 = vector.load %arg4[%c0_13, %c0_14, %c0_15] : memref<1x1x256xf32, #tpu.memory_space<vmem>>, vector<1x1x256xf32>
    %33 = vector.shape_cast %32 : vector<1x1x256xf32> to vector<1x256xf32>
    %34 = vector.shape_cast %31 : vector<1x256xf32> to vector<1x1x256xf32>
    tpu.vector_store %arg4[%c0_13, %c0_14, %c0_15], %34 {strides = array<i32>} : memref<1x1x256xf32, #tpu.memory_space<vmem>>, vector<1x1x256xf32>,
    return
  }
  func.func @transform_0(%arg0: i32, %arg1: i32) -> (i32, i32, i32) {
    %c0_i32 = arith.constant 0 : i32
    %c0_i32_0 = arith.constant 0 : i32
    return %arg0, %c0_i32, %arg1 : i32, i32, i32
  }
  func.func @transform_1(%arg0: i32, %arg1: i32) -> (i32, i32, i32) {
    %c0_i32 = arith.constant 0 : i32
    %c0_i32_0 = arith.constant 0 : i32
    return %arg0, %c0_i32, %arg1 : i32, i32, i32
  }
  func.func @transform_2(%arg0: i32, %arg1: i32) -> (i32, i32, i32) {
    %c0_i32 = arith.constant 0 : i32
    %c0_i32_0 = arith.constant 0 : i32
    return %arg0, %c0_i32, %arg1 : i32, i32, i32
  }
}

</mosaic_0001>

<bundles_post_ra>
// kernel: tpu_custom_call.1
= control target key start
LH: loop header
LB: loop body
LE: loop exit
PB: predicated region body
PF: predicated region fallthrough
CT: control target
= control target key end

     0   :  { %7 = vsyncpa [#allocation3], 0  ;;  %s943_s0 = inlined_call_operand.hbm [shape: s32[2,1,256], index: 0, kind: input, shape index: {}]   ;;  %s944_s1 = inlined_call_operand.hbm [shape: f32[2,16,256], index: 1, kind: input, shape index: {}]   ;;  %s945_s2 = inlined_call_operand.hbm [shape: f32[2,1,256], index: 2, kind: output, shape index: {}]  }
   0x1   :  { %9 = vsyncpa [#allocation3 + $0x1], 0 }
   0x2   :  { %10 = vsyncpa [#allocation6], 0 }
   0x3   :  { %12 = vsyncpa [#allocation6 + $0x1], 0 }
   0x4   :  { %13 = vsyncpa [#allocation4], 0 }
   0x5   :  { %15 = vsyncpa [#allocation4 + $0x1], 0  ;;  %s752_s9 = smov 0   ;;  %s754_s10 = smov 0  }
   0x6   :  { %s756_s11 = smov 0   ;;  %s758_s12 = smov 0  }
   0x7   :  { %s760_s13 = smov 0   ;;  %s762_s14 = smov 0  }
   0x8 LB: > { %s485_s15 = sadd.s32 4294967295, %s729_s14   ;;  %s486_s16 = sadd.s32 4294967294, %s729_s14   ;;  %s729_s14 = sphi %s762_s14, %s21_s14   ;;  %s725_s13 = sphi %s760_s13, %s957_s13   ;;  %s721_s12 = sphi %s758_s12, %s956_s12   ;;  %s717_s11 = sphi %s756_s11, %s955_s11   ;;  %s713_s10 = sphi %s754_s10, %s954_s10   ;;  %s709_s9 = sphi %s752_s9, %s953_s9  }
   0x9   : > { %s33_s17 = sadd.s32 1, %s725_s13  ;;  %s42_s18 = sadd.s32 1, %s717_s11 }
   0xa   : > { %p35_p0 = scmp.ge.s32.totalorder %s33_s17, 2  ;;  %p49_p1 = scmp.ne.s32.totalorder %s717_s11, %s713_s10 }
   0xb   : > { %p50_p2 = scmp.eq.s32.totalorder %s729_s14, 0  ;;  %p55_p3 = scmp.ne.s32.totalorder %s713_s10, %s709_s9 }
   0xc   : > { %s959_s17 = smov (%p35_p0, %s33_s17), 0  ;;  %p56_p5 = scmp.eq.s32.totalorder %s485_s15, 0 }
   0xd   : > { %p793_p4 = por %p50_p2, %p49_p1  ;;  %s37_s20 = ssub.s32 %s725_s13, %s959_s17 }
   0xe   : > { %p109_p6 = scmp.eq.s32.totalorder %s485_s15, 1  ;;  %p40_p7 = scmp.eq.s32.totalorder %s37_s20, 0 }
   0xf   : > { %p799_p8 = por %p56_p5, %p55_p3  ;;  %p115_p10 = scmp.eq.s32.totalorder %s486_s16, 1 }
  0x10   : > { %p803_p9 = por %p109_p6, %p49_p1  ;;  %p524_p13 = scmp.lt.s32.totalorder %s729_s14, 2 }
  0x11   : > { %s808_s23 = scalar_select %p40_p7, %s717_s11, %s42_s18  }
  0x12   : > { %p810_p11 = por %p115_p10, %p55_p3  ;;  %s817_s25 = sand.u32 1, %s717_s11  }
  0x13   : > { %s489_s26 = sshll.u32 %s817_s25, 1  ;;  %s504_s27 = sshll.u32 %s725_s13, 5 }
  0x14   : > { %s147_s30 = scalar_lea.hbm %s943_s0, %s504_s27  ;;  %s139_s3 = scalar_lea.vmem [#allocation2], %s489_s26 }
  0x15   : > { %s149_s4 = sshll.u32 %s139_s3, 4  ;;  %p826_p0 = pnand %p524_p13, %p793_p4  ;;  %s150_s4 = int_to_ptr.vmem [resolvable:$true] %s149_s4 }
  0x16   : > { %p495_p1 = scmp.ge.s32.totalorder %s729_s14, 1  ;;  %p177_p2 = scmp.lt.s32.totalorder %s729_s14, 3 }
  0x17   : > { %s136_s6 = scalar_lea.sflag [#allocation3], %s817_s25  ;;  %p591_p3 = pneg %p826_p0 }
  0x18   : > { %s602_s7 = scalar_lea.vmem %s150_s4, 32  ;;  %s731_s8 = smov [#allocation2]  }
  0x19   : > { %p603_p5 = scmp.ne.s32.totalorder %s150_s4, %s602_s7  ;;  %s607_s15 = sshll.u32 %s731_s8, 4  ;;  %s608_s15 = int_to_ptr.vmem [resolvable:$false] %s607_s15 }
  0x1a   : > { %s609_s16 = scalar_lea.vmem %s608_s15, 64  ;;  %p610_p4 = scmp.lt.s32.totalorder %s150_s4, %s608_s15 }
  0x1b   : > { %p605_p6 = pnand %p603_p5, %p591_p3  ;;  %p611_p10 = scmp.lt.s32.totalorder %s609_s16, %s602_s7 }
  0x1d   : > { %p606_p7 = pneg %p605_p6  ;;  %p612_p13 = por %p611_p10, %p610_p4 }
  0x1f   : > { %p613_p12 = pnand %p612_p13, %p606_p7 }
  0x21   : > { %616 = shalt.err (!%p613_p12)
}
  0x22   : > { %516 = dma.hbm_to_vmem [thread:$0]  (!%p826_p0), %s147_s30, 32, %s150_s4, %s136_s6  }
  0x23   : > { %p844_p5 = pnand %p495_p1, %p177_p2  ;;  %s492_s19 = sshll.u32 %s817_s25, 5 }
  0x24   : > { %s505_s20 = sshll.u32 %s725_s13, 9  ;;  %s160_s29 = scalar_lea.vmem [#allocation5], %s492_s19 }
  0x25   : > { %s168_s28 = scalar_lea.hbm %s944_s1, %s505_s20  ;;  %s169_s3 = sshll.u32 %s160_s29, 4  ;;  %s170_s3 = int_to_ptr.vmem [resolvable:$true] %s169_s3 }
  0x26   : > { %s157_s7 = scalar_lea.sflag [#allocation6], %s817_s25  ;;  %s630_s8 = scalar_lea.vmem %s170_s3, 512 }
  0x27   : > { %p631_p12 = scmp.ne.s32.totalorder %s170_s3, %s630_s8  ;;  %s732_s30 = smov [#allocation5]  }
  0x28   : > { %s635_s4 = sshll.u32 %s732_s30, 4  ;;  %s636_s4 = int_to_ptr.vmem [resolvable:$false] %s635_s4 }
  0x29   : > { %p633_p6 = pnand %p631_p12, %p591_p3  ;;  %s637_s6 = scalar_lea.vmem %s636_s4, 1024 }
  0x2a   : > { %p638_p1 = scmp.lt.s32.totalorder %s170_s3, %s636_s4  ;;  %p639_p2 = scmp.lt.s32.totalorder %s637_s6, %s630_s8 }
  0x2b   : > { %p634_p7 = pneg %p633_p6 }
  0x2c   : > { %p640_p4 = por %p639_p2, %p638_p1 }
  0x2e   : > { %p641_p10 = pnand %p640_p4, %p634_p7 }
  0x30   : > { %644 = shalt.err (!%p641_p10)
}
  0x31   : > { %s733_s15 = smov 256   ;;  %s734_s16 = smov 16  }
  0x32   : > { %519 = dma.hbm_to_vmem [thread:$0]  (!%p826_p0), %s168_s28, 512, %s170_s3, %s157_s7, %s733_s15, %s733_s15, %s734_s16  }
  0x33   : > { %181 = sbr.rel (%p844_p5) target bundleno = 156 (0x9c), region = 28  ;;  %s862_s25 = sand.u32 (!%p844_p5), 1, %s713_s10  }
  0x34   : > { %s496_s19 = sshll.u32 (!%p844_p5), %s862_s25, 1  ;;  %s184_s20 = scalar_lea.sflag (!%p844_p5), [#allocation3], %s862_s25 }
  0x35   : > { %s868_s26 = scalar_lea.vmem (!%p844_p5), [#allocation2], %s496_s19 }
  0x38   : > { %696 = dma.done.wait (%p799_p8), %s184_s20, 32  }
  0x39   : > { %698 = vsyncadd (%p799_p8), %s184_s20, 4294967264  ;;  %s497_s5 = sshll.u32 %s862_s25, 5  ;;  %s193_s18 = scalar_lea.sflag [#allocation6], %s862_s25 }
  0x3a   : > { %s196_s27 = scalar_lea.vmem [#allocation5], %s497_s5 }
  0x3b   : > { %700 = dma.done.wait (%p799_p8), %s193_s18, 512  }
  0x3c   : > { %702 = vsyncadd (%p799_p8), %s193_s18, 4294966784  ;;  %v225_v0 = vld [vmem:[%s196_s27] sm:$0xff]  ;;  %v226_v1 = vld [vmem:[%s196_s27 + $0x8] sm:$0xff]  ;;  %v276_v24 = vlaneseq  ;;  %s221_s21 = scalar_lea.vmem [#allocation7], %s496_s19  ;;  %s506_s29 = sshll.u32 %s721_s12, 5 }
  0x3d   : > { %v227_v2 = vld [vmem:[%s196_s27 + $0x10] sm:$0xff]  ;;  %v228_v3 = vld [vmem:[%s196_s27 + $0x18] sm:$0xff]  ;;  %s375_s28 = sshll.u32 %s221_s21, 4  ;;  %s373_s8 = scalar_lea.hbm %s945_s2, %s506_s29  ;;  %s376_s28 = int_to_ptr.vmem [resolvable:$true] %s375_s28 }
  0x3e   : > { %v230_v4 = vmax.f32 %v225_v0, %v227_v2  ;;  %v237_v5 = vmax.f32 %v226_v1, %v228_v3  ;;  %v889_v27 = vshrl.u32 %v276_v24, 7  ;;  %v229_v29 = vld [vmem:[%s868_s26] sm:$0x3]  ;;  %v309_v51 = vadd.f32 %v227_v2, %v225_v0  ;;  %s359_s30 = scalar_lea.sflag [#allocation4], %s862_s25  ;;  %s645_s4 = scalar_lea.vmem %s376_s28, 32 }
  0x3f   : > { %v316_v53 = vadd.f32 %v228_v3, %v226_v1  ;;  %vm355_vm4 = vcmp.lt.s32.totalorder %v276_v24, 256  ;;  %p646_p8 = scmp.ne.s32.totalorder %s376_s28, %s645_s4  ;;  %s736_s6 = smov [#allocation7]  }
  0x40   : > { %v231_v6 = vrot.slane %v230_v4, 4  ;;  %v238_v7 = vrot.slane %v237_v5, 4  ;;  %v281_v28 = vsub.s32 0, %v889_v27  ;;  %v285_v30 = vsub.s32 1, %v889_v27  ;;  %s649_s15 = sshll.u32 %s736_s6, 4  ;;  %s650_s15 = int_to_ptr.vmem [resolvable:$false] %s649_s15 }
  0x41   : > { %v278_v31 = vadd.s32 8, %v889_v27  ;;  %v310_v59 = vrot.slane %v309_v51, 4  ;;  %v317_v61 = vrot.slane %v316_v53, 4  ;;  %p647_p0 = pnand %p646_p8, %p803_p9  ;;  %s651_s12 = scalar_lea.vmem %s650_s15, 64 }
  0x42   : > { %v232_v8 = vmax.f32 %v230_v4, %v231_v6  ;;  %v239_v9 = vmax.f32 %v237_v5, %v238_v7  ;;  %v282_v32 = vrot.slane %v229_v29, %v281_v28  ;;  %v286_v33 = vrot.slane %v229_v29, %v285_v30  ;;  %p652_p13 = scmp.lt.s32.totalorder %s376_s28, %s650_s15  ;;  %p653_p5 = scmp.lt.s32.totalorder %s651_s12, %s645_s4 }
  0x43   : > { %v311_v6 = vadd.f32 %v310_v59, %v309_v51  ;;  %v318_v7 = vadd.f32 %v317_v61, %v316_v53  ;;  %v735_v30 = vmov 1966171168   ;;  %p648_p3 = pneg %p647_p0 }
  0x44   : > { %v233_v10 = vrot.slane %v232_v8, 2  ;;  %v240_v11 = vrot.slane %v239_v9, 2  ;;  %vm287_vm0 = vcmp.eq.s32.totalorder %v889_v27, %v282_v32  ;;  %vm289_vm1 = vcmp.eq.s32.totalorder %v278_v31, %v282_v32  ;;  %p654_p12 = por %p653_p5, %p652_p13 }
  0x45   : > { %vm288_vm2 = vcmp.eq.s32.totalorder %v889_v27, %v286_v33  ;;  %vm290_vm3 = vcmp.eq.s32.totalorder %v278_v31, %v286_v33  ;;  %v291_v40 = vsel %vm287_vm0, %v225_v0, 0.0  ;;  %v293_v41 = vsel %vm289_vm1, %v227_v2, 0.0 }
  0x46   : > { %v234_v12 = vmax.f32 %v232_v8, %v233_v10  ;;  %v241_v13 = vmax.f32 %v239_v9, %v240_v11  ;;  %v292_v43 = vsel %vm288_vm2, %v226_v1, 0.0  ;;  %v294_v44 = vsel %vm290_vm3, %v228_v3, 0.0  ;;  %p655_p6 = pnand %p654_p12, %p648_p3 }
  0x47   : > { %v295_v47 = vadd.f32 %v293_v41, %v291_v40  ;;  %v302_v49 = vadd.f32 %v294_v44, %v292_v43  ;;  %v339_v31 = vunpack.c.l.s4 %v735_v30 }
  0x48   : > { %v235_v14 = vrot.slane %v234_v12, 1  ;;  %v242_v15 = vrot.slane %v241_v13, 1 }
  0x49   : > { %v296_v55 = vrot.slane %v295_v47, 4  ;;  %v303_v57 = vrot.slane %v302_v49, 4  ;;  %v340_v40 = vunpack.c.0.s8 %v339_v31 }
  0x4a   : > { %v880_v16 = vmax.f32 %v234_v12, %v235_v14  ;;  %v882_v17 = vmax.f32 %v241_v13, %v242_v15 }
  0x4b   : > { %v297_v63 = vadd.f32 %v296_v55, %v295_v47  ;;  %v304_v5 = vadd.f32 %v303_v57, %v302_v49  ;;  %v343_v43 = vsub.s32 %v340_v40, %v889_v27 }
  0x4c   : > { %v244_v18 = vsub.f32 %v225_v0, %v880_v16  ;;  %v246_v19 = vsub.f32 %v227_v2, %v880_v16  ;;  %v245_v20 = vsub.f32 %v226_v1, %v882_v17  ;;  %v247_v21 = vsub.f32 %v228_v3, %v882_v17 }
  0x4d   : > { %v298_v8 = vrot.slane %v297_v63, 2  ;;  %v305_v0 = vrot.slane %v304_v5, 2  ;;  %v312_v2 = vrot.slane %v311_v6, 2  ;;  %v319_v1 = vrot.slane %v318_v7, 2 }
  0x4e   : > { %v248_v22 = vmul.f32 1.442695, %v244_v18  ;;  %v252_v23 = vmul.f32 1.442695, %v246_v19  ;;  %v250_v25 = vmul.f32 1.442695, %v245_v20 }
  0x4f   : > { %v254_v26 = vmul.f32 1.442695, %v247_v21  ;;  %v299_v3 = vadd.f32 %v298_v8, %v297_v63  ;;  %v306_v9 = vadd.f32 %v305_v0, %v304_v5  ;;  %v313_v10 = vadd.f32 %v312_v2, %v311_v6 }
  0x50   : > { %577 = vpow2.f32 %v248_v22  ;;  %v320_v11 = vadd.f32 %v319_v1, %v318_v7 }
  0x51   : > { %579 = vpow2.f32 %v250_v25  ;;  %v300_v12 = vrot.slane %v299_v3, 1  ;;  %v307_v13 = vrot.slane %v306_v9, 1  ;;  %v314_v14 = vrot.slane %v313_v10, 1 }
  0x52   : > { %581 = vpow2.f32 %v252_v23  ;;  %v321_v18 = vrot.slane %v320_v11, 1 }
  0x53   : > { %583 = vpow2.f32 %v254_v26  ;;  %v301_v21 = vadd.f32 %v300_v12, %v299_v3  ;;  %v308_v23 = vadd.f32 %v307_v13, %v306_v9  ;;  %v315_v26 = vadd.f32 %v314_v14, %v313_v10 }
  0x54   : > { %v322_v29 = vadd.f32 %v321_v18, %v320_v11 }
  0x5d   : > { %v578_v34 = vpop.eup %577 }
  0x5e   : > { %v580_v35 = vpop.eup %579 }
  0x5f   : > { %v582_v36 = vpop.eup %581 }
  0x60   : > { %v584_v37 = vpop.eup %583  ;;  %v256_v38 = vadd.f32 %v582_v36, %v578_v34 }
  0x61   : > { %v263_v39 = vadd.f32 %v584_v37, %v580_v35 }
  0x62   : > { %v257_v42 = vrot.slane %v256_v38, 4 }
  0x63   : > { %v264_v45 = vrot.slane %v263_v39, 4 }
  0x64   : > { %v258_v46 = vadd.f32 %v257_v42, %v256_v38 }
  0x65   : > { %v265_v48 = vadd.f32 %v264_v45, %v263_v39 }
  0x66   : > { %v259_v50 = vrot.slane %v258_v46, 2 }
  0x67   : > { %v266_v52 = vrot.slane %v265_v48, 2 }
  0x68   : > { %v260_v54 = vadd.f32 %v259_v50, %v258_v46 }
  0x69   : > { %v267_v56 = vadd.f32 %v266_v52, %v265_v48 }
  0x6a   : > { %v261_v58 = vrot.slane %v260_v54, 1 }
  0x6b   : > { %v268_v60 = vrot.slane %v267_v56, 1 }
  0x6c   : > { %v262_v62 = vadd.f32 %v261_v58, %v260_v54 }
  0x6d   : > { %v269_v4 = vadd.f32 %v268_v60, %v267_v56 }
  0x6e   : > { %585 = vlog2.f32 %v262_v62 }
  0x6f   : > { %587 = vlog2.f32 %v269_v4 }
  0x7b   : > { %v586_v15 = vpop.eup %585 }
  0x7c   : > { %v588_v19 = vpop.eup %587  ;;  %v271_v20 = vmul.f32 0.6931472, %v586_v15 }
  0x7d   : > { %v273_v22 = vmul.f32 0.6931472, %v588_v19 }
  0x7e   : > { %v274_v25 = vadd.f32 %v271_v20, %v880_v16 }
  0x7f   : > { %v275_v28 = vadd.f32 %v273_v22, %v882_v17 }
  0x80   : > { %v323_v32 = vsub.f32 %v301_v21, %v274_v25  ;;  %v327_v33 = vmul.f32 16.0, %v274_v25 }
  0x81   : > { %v324_v34 = vsub.f32 %v308_v23, %v275_v28  ;;  %v328_v35 = vmul.f32 16.0, %v275_v28 }
  0x82   : > { %v325_v36 = vmul.f32 -0.8933333, %v323_v32  ;;  %v329_v37 = vsub.f32 %v315_v26, %v327_v33 }
  0x83   : > { %v326_v38 = vmul.f32 -0.8933333, %v324_v34  ;;  %v330_v39 = vsub.f32 %v322_v29, %v328_v35 }
  0x84   : > { %v331_v41 = vmul.f32 0.006666667, %v329_v37 }
  0x85   : > { %v332_v16 = vmul.f32 0.006666667, %v330_v39 }
  0x86   : > { %v333_v42 = vsub.f32 %v325_v36, %v331_v41 }
  0x87   : > { %v334_v17 = vsub.f32 %v326_v38, %v332_v16 }
  0x89   : > { %v337_v44 = vcombine.low %v333_v42, %v334_v17 }
  0x8b   : > { %v344_v45 = vrot.slane %v337_v44, %v343_v43 }
  0x8d   : > { %v351_v46 = vrot.slane %v344_v45, %v343_v43 }
  0x8f   : > { %357 = vst.msk [vmem:[%s221_s21] sm:$0x3] %vm355_vm4, %v351_v46 }
  0x90   : > { %658 = shalt.err (!%p655_p6)
}
  0x91   : > { %s659_s16 = scalar_lea.hbm %s373_s8, 32  ;;  %s663_s20 = scalar_lea.hbm %s945_s2, 64 }
  0x92   : > { %p660_p7 = scmp.ne.s32.totalorder %s373_s8, %s659_s16  ;;  %p664_p4 = scmp.lt.s32.totalorder %s373_s8, %s945_s2 }
  0x93   : > { %p665_p10 = scmp.lt.s32.totalorder %s663_s20, %s659_s16 }
  0x94   : > { %p661_p1 = pnand %p660_p7, %p803_p9 }
  0x95   : > { %p666_p8 = por %p665_p10, %p664_p4 }
  0x96   : > { %p662_p2 = pneg %p661_p1 }
  0x98   : > { %p667_p0 = pnand %p666_p8, %p662_p2 }
  0x9a   : > { %670 = shalt.err (!%p667_p0)
}
  0x9b   : > { %511 = dma.vmem_to_hbm [thread:$0]  (%p803_p9), %s376_s28, 32, %s373_s8, %s359_s30  }
  0x9c PF: > { %s387_s18 = sand.u32 1, %s709_s9   ;;  %p952_p3 = scmp.ge.s32.totalorder %s729_s14, 2 }
  0x9d   : > { %s388_s27 = scalar_lea.sflag [#allocation4], %s387_s18 }
  0x9e   : > { %p521_p13 = pnand %p952_p3, %p810_p11 }
  0xa0   : > { %p522_p5 = pneg %p521_p13 }
  0xa2   : > { %704 = dma.done.wait (%p522_p5), %s388_s27, 32  }
  0xa3   : > { %706 = vsyncadd (%p522_p5), %s388_s27, 4294967264  ;;  %s21_s14 = sadd.s32 1, %s729_s14   ;;  %s953_s9 = smov %s713_s10 }
  0xa4   : > { %p18_p12 = scmp.ge.s32.totalorder %s21_s14, 4   ;;  %s954_s10 = smov %s717_s11 }
  0xa5   : > { %s955_s11 = smov %s808_s23  ;;  %s956_s12 = smov %s725_s13 }
  0xa6   : > { %s957_s13 = smov %s959_s17  ;;  %20 = sbr.rel (!%p18_p12) target bundleno = 8 (0x8), region = 86 }
  0xab   :  { %393 = vsyncpa [#allocation3], 1 }
  0xac   :  { %395 = vsyncpa [#allocation3 + $0x1], 1 }
  0xad   :  { %396 = vsyncpa [#allocation6], 1 }
  0xae   :  { %398 = vsyncpa [#allocation6 + $0x1], 1 }
  0xaf   :  { %399 = vsyncpa [#allocation4], 1 }
  0xb0   :  { %401 = vsyncpa [#allocation4 + $0x1], 1 }

</bundles_post_ra>
